<compile_context>
chip_gen: v7x
topology: tpu7x:2x2x1
jax: 0.10.0
libtpu: 0.0.40
codegen_flags: <defaults>
</compile_context>

<pallas_src>
import functools

import jax
import jax.numpy as jnp
from jax.experimental import pallas as pl
from jax.experimental.pallas import tpu as pltpu

L1 = 17 + 3          # 20: concatenated sequence length (fixed by Linear(4*(17+3), .))
P1 = L1 // 2         # 10 after first maxpool
P2 = P1 // 2         # 5  after second maxpool
C1, C2 = 8, 16
FLAT = P2 * C2       # 80 == 4 * (17 + 3)
H1, H2 = 1024, 32
EPS = 1e-5


def _flf_kernel(x_ref, w1_ref, b1_ref, w2_ref, b2_ref, wf_ref, bf_ref, out_ref):
    nl = x_ref.shape[1]                       # lanes in this block (multiple of 128)
    x = x_ref[...]                            # (22, BLK) zero-padded input, lane = sample

    # ---- Conv1d(1,8,k=3,p=1) + BN1 + ReLU as one structured matmul --------
    # TODO(synk): BatchNorm1d uses inference-mode running stats (folded);
    #             training-mode batch statistics are not implemented.
    h1 = jnp.dot(w1_ref[...], x, preferred_element_type=jnp.float32)   # (160, BLK)
    h1 = jnp.maximum(h1 + b1_ref[...], 0.0)   # rows ordered (position, channel)

    # ---- MaxPool1d(2,2): elementwise max of adjacent 8-row groups ----------
    h1 = h1.reshape(P1, 2, C1, nl)            # leading-dim reshape: free re-tiling
    p1 = jnp.maximum(h1[:, 0], h1[:, 1]).reshape(P1 * C1, nl)          # (80, BLK)

    # ---- Conv1d(8,16,k=3,p=1) + BN2 + ReLU as one structured matmul --------
    zpad = jnp.zeros((C1, nl), jnp.float32)
    p1pad = jnp.concatenate([zpad, p1, zpad], axis=0)                  # (96, BLK)
    h2 = jnp.dot(w2_ref[...], p1pad, preferred_element_type=jnp.float32)  # (160, BLK)
    h2 = jnp.maximum(h2 + b2_ref[...], 0.0)

    # ---- MaxPool1d(2,2) + transpose(1,2).flatten(1) -------------------------
    h2 = h2.reshape(P2, 2, C2, nl)
    flat = jnp.maximum(h2[:, 0], h2[:, 1]).reshape(P2 * C2, nl)        # (80, BLK)
    # rows are already in PyTorch flatten order: position*16 + channel.

    # ---- folded regressor fc1∘fc2∘(eval dropout)∘fc3: exact affine map ------
    # TODO(synk): Dropout(0.1) is identity in eval mode; train-mode masking
    #             is not implemented.
    y = jnp.dot(wf_ref[...], flat, preferred_element_type=jnp.float32)  # (1, BLK)
    out_ref[...] = y + bf_ref[...]


def _round_up(n, m):
    return ((n + m - 1) // m) * m


@functools.partial(jax.jit, static_argnames=("block_b",))
def flf_net_forward(x1, x2, params, *, block_b=1024):
    """x1: (B, 1, 17), x2: (B, 1, 3) in PyTorch NCL layout -> (B, 1). Eval mode."""
    B = x1.shape[0]
    block_b = max(128, (int(block_b) // 128) * 128)
    blk = min(block_b, _round_up(B, 128))          # lanes per grid step
    bp = _round_up(B, blk)                         # padded batch (multiple of blk)

    # glue: concat along length, drop the channel dim, go lane-major (batch
    # last), zero-pad one length position each side (conv1 padding) and pad
    # the batch out to a whole number of lane blocks.
    x = jnp.concatenate([x1, x2], axis=2)[:, 0, :]                     # (B, 20)
    xt = jnp.pad(x.T.astype(jnp.float32), ((1, 1), (0, bp - B)))       # (22, bp)

    # ---- fold BatchNorm (eval) scale/shift into conv weights/biases --------
    s1 = params['bn1_gamma'] * jax.lax.rsqrt(params['bn1_var'] + EPS)
    w1f = params['conv1_w'][:, 0, :] * s1[:, None]                     # (8, 3)
    b1f = (params['conv1_b'] - params['bn1_mean']) * s1 + params['bn1_beta']
    s2 = params['bn2_gamma'] * jax.lax.rsqrt(params['bn2_var'] + EPS)
    w2f = params['conv2_w'] * s2[:, None, None]                        # (16, 8, 3)
    b2f = (params['conv2_b'] - params['bn2_mean']) * s2 + params['bn2_beta']

    # ---- lower both convs to structured-sparse matrices (host-side, tiny) ---
    rows = []
    for l in range(L1):
        z = jnp.zeros((C1, L1 + 2), jnp.float32)
        rows.append(z.at[:, l:l + 3].set(w1f))
    w1m = jnp.concatenate(rows, axis=0)                                # (160, 22)
    b1m = jnp.tile(b1f, L1).reshape(L1 * C1, 1)                        # (160, 1)

    rows = []
    for l in range(P1):
        z = jnp.zeros((C2, (P1 + 2) * C1), jnp.float32)
        for k in range(3):
            z = z.at[:, (l + k) * C1:(l + k + 1) * C1].set(w2f[:, :, k])
        rows.append(z)
    w2m = jnp.concatenate(rows, axis=0)                                # (160, 96)
    b2m = jnp.tile(b2f, P1).reshape(P1 * C2, 1)                        # (160, 1)

    # ---- fold fc1 -> fc2 -> (eval dropout) -> fc3 into one affine map ------
    wfm = params['fc3_w'] @ params['fc2_w'] @ params['fc1_w']          # (1, 80)
    bfm = (params['fc3_w'] @ (params['fc2_w'] @ params['fc1_b'] + params['fc2_b'])
           + params['fc3_b']).reshape(1, 1)                            # (1, 1)

    def rep(shape):
        return pl.BlockSpec(shape, lambda i: (0,) * len(shape))

    flops = 2 * bp * (L1 * C1 * (L1 + 2) + P1 * C2 * (P1 + 2) * C1 + FLAT)
    bytes_accessed = 4 * (bp * (L1 + 2) + bp + w1m.size + b1m.size
                          + w2m.size + b2m.size + wfm.size + 1)

    out = pl.pallas_call(
        _flf_kernel,
        out_shape=jax.ShapeDtypeStruct((1, bp), jnp.float32),
        grid=(bp // blk,),
        in_specs=[pl.BlockSpec((L1 + 2, blk), lambda i: (0, i)),
                  rep((L1 * C1, L1 + 2)), rep((L1 * C1, 1)),
                  rep((P1 * C2, (P1 + 2) * C1)), rep((P1 * C2, 1)),
                  rep((1, FLAT)), rep((1, 1))],
        out_specs=pl.BlockSpec((1, blk), lambda i: (0, i)),
        compiler_params=pltpu.CompilerParams(
            dimension_semantics=("parallel",),
            vmem_limit_bytes=32 * 1024 * 1024),
        cost_estimate=pl.CostEstimate(flops=flops, transcendentals=0,
                                      bytes_accessed=bytes_accessed),
    )(xt, w1m, b1m, w2m, b2m, wfm, bfm)

    return out[0, :B].reshape(B, 1)


def _ref_forward(x1, x2, p):
    """Pure-JAX reference mirroring the PyTorch forward (eval mode), unfused."""
    def conv1d(x, w, b):
        B, Cin, L = x.shape
        xp = jnp.pad(x, ((0, 0), (0, 0), (1, 1)))
        out = jnp.zeros((B, w.shape[0], L), jnp.float32)
        for k in range(3):
            out = out + jnp.einsum('bcl,oc->bol', xp[:, :, k:k + L], w[:, :, k])
        return out + b[None, :, None]

    def bn(x, g, bta, m, v):
        return (x - m[None, :, None]) / jnp.sqrt(v[None, :, None] + EPS) \
               * g[None, :, None] + bta[None, :, None]

    def pool(x):
        B, C, L = x.shape
        return jnp.max(x.reshape(B, C, L // 2, 2), axis=-1)

    x = jnp.concatenate([x1, x2], axis=2)
    y = pool(jax.nn.relu(bn(conv1d(x, p['conv1_w'], p['conv1_b']),
                            p['bn1_gamma'], p['bn1_beta'], p['bn1_mean'], p['bn1_var'])))
    y = pool(jax.nn.relu(bn(conv1d(y, p['conv2_w'], p['conv2_b']),
                            p['bn2_gamma'], p['bn2_beta'], p['bn2_mean'], p['bn2_var'])))
    B = y.shape[0]
    flat = jnp.transpose(y, (0, 2, 1)).reshape(B, -1)
    y = flat @ p['fc1_w'].T + p['fc1_b']
    y = y @ p['fc2_w'].T + p['fc2_b']
    y = y @ p['fc3_w'].T + p['fc3_b']
    return y


if __name__ == "__main__":
    B = 2
    keys = jax.random.split(jax.random.PRNGKey(0), 20)
    nrm = lambda k, shape, s=1.0: s * jax.random.normal(k, shape, jnp.float32)

    params = {
        'conv1_w': nrm(keys[0], (C1, 1, 3), 0.3),
        'conv1_b': nrm(keys[1], (C1,), 0.1),
        'bn1_gamma': 1.0 + nrm(keys[2], (C1,), 0.1),
        'bn1_beta': nrm(keys[3], (C1,), 0.1),
        'bn1_mean': nrm(keys[4], (C1,), 0.1),
        'bn1_var': 1.0 + 0.1 * jax.random.uniform(keys[5], (C1,), jnp.float32),
        'conv2_w': nrm(keys[6], (C2, C1, 3), 0.2),
        'conv2_b': nrm(keys[7], (C2,), 0.1),
        'bn2_gamma': 1.0 + nrm(keys[8], (C2,), 0.1),
        'bn2_beta': nrm(keys[9], (C2,), 0.1),
        'bn2_mean': nrm(keys[10], (C2,), 0.1),
        'bn2_var': 1.0 + 0.1 * jax.random.uniform(keys[11], (C2,), jnp.float32),
        'fc1_w': nrm(keys[12], (H1, FLAT), 0.05),
        'fc1_b': nrm(keys[13], (H1,), 0.05),
        'fc2_w': nrm(keys[14], (H2, H1), 0.05),
        'fc2_b': nrm(keys[15], (H2,), 0.05),
        'fc3_w': nrm(keys[16], (1, H2), 0.1),
        'fc3_b': nrm(keys[17], (1,), 0.1),
    }

    x1 = jax.random.normal(keys[18], (B, 1, 17), jnp.float32)
    x2 = jax.random.normal(keys[19], (B, 1, 3), jnp.float32)

    out = jax.block_until_ready(flf_net_forward(x1, x2, params))
    ref = jax.block_until_ready(_ref_forward(x1, x2, params))
    assert out.shape == (B, 1), out.shape
    err = float(jnp.max(jnp.abs(out - ref)))
    if err > 5e-2:
        raise AssertionError(f"kernel/reference mismatch: max abs err {err}")
    print("KERNEL_OK")
</pallas_src>

<mosaic_0001>
module attributes {stable_mosaic.version = 11 : i64} {
  func.func @_flf_kernel(%arg0: i32, %arg1: memref<22x128xf32, #tpu.memory_space<vmem>>, %arg2: memref<160x22xf32, #tpu.memory_space<vmem>>, %arg3: memref<160x1xf32, #tpu.memory_space<vmem>>, %arg4: memref<160x96xf32, #tpu.memory_space<vmem>>, %arg5: memref<160x1xf32, #tpu.memory_space<vmem>>, %arg6: memref<1x80xf32, #tpu.memory_space<vmem>>, %arg7: memref<1x1xf32, #tpu.memory_space<vmem>>, %arg8: memref<1x128xf32, #tpu.memory_space<vmem>>) attributes {dimension_semantics = [#tpu.dimension_semantics<parallel>], iteration_bounds = array<i64: 1>, scalar_prefetch = 0 : i64, scratch_operands = 0 : i64, tpu.core_type = #tpu.core_type<tc>, window_params = [{transform_indices = @transform_0, window_bounds = array<i64: 22, 128>}, {pipeline_mode = #tpu.pipeline_mode<synchronous>, transform_indices = @transform_1, window_bounds = array<i64: 160, 22>}, {pipeline_mode = #tpu.pipeline_mode<synchronous>, transform_indices = @transform_2, window_bounds = array<i64: 160, 1>}, {pipeline_mode = #tpu.pipeline_mode<synchronous>, transform_indices = @transform_3, window_bounds = array<i64: 160, 96>}, {pipeline_mode = #tpu.pipeline_mode<synchronous>, transform_indices = @transform_4, window_bounds = array<i64: 160, 1>}, {pipeline_mode = #tpu.pipeline_mode<synchronous>, transform_indices = @transform_5, window_bounds = array<i64: 1, 80>}, {pipeline_mode = #tpu.pipeline_mode<synchronous>, transform_indices = @transform_6, window_bounds = array<i64: 1, 1>}, {transform_indices = @transform_7, window_bounds = array<i64: 1, 128>}]} {
    %c0 = arith.constant 0 : index
    %c0_0 = arith.constant 0 : index
    %0 = vector.load %arg1[%c0, %c0_0] : memref<22x128xf32, #tpu.memory_space<vmem>>, vector<22x128xf32>
    %c0_1 = arith.constant 0 : index
    %c0_2 = arith.constant 0 : index
    %1 = vector.load %arg2[%c0_1, %c0_2] : memref<160x22xf32, #tpu.memory_space<vmem>>, vector<160x22xf32>
    %cst = arith.constant dense<0.000000e+00> : vector<160x128xf32>
    %2 = tpu.matmul %1, %0, %cst {dimension_numbers = #tpu.dot_dimension_numbers<[1], [0], [0], [1], [0, 0, 1, 1], [], []>} : vector<160x22xf32>, vector<22x128xf32>, vector<160x128xf32> -> vector<160x128xf32>
    %c0_3 = arith.constant 0 : index
    %c0_4 = arith.constant 0 : index
    %3 = vector.load %arg3[%c0_3, %c0_4] : memref<160x1xf32, #tpu.memory_space<vmem>>, vector<160x1xf32>
    %4 = vector.broadcast %3 : vector<160x1xf32> to vector<160x128xf32>
    %5 = arith.addf %2, %4 : vector<160x128xf32>
    %cst_5 = arith.constant 0.000000e+00 : f32
    %6 = vector.broadcast %cst_5 : f32 to vector<160x128xf32>
    %7 = arith.maximumf %5, %6 : vector<160x128xf32>
    %8 = vector.shape_cast %7 : vector<160x128xf32> to vector<10x2x8x128xf32>
    %9 = vector.extract_strided_slice %8 {offsets = [0, 0, 0, 0], sizes = [10, 1, 8, 128], strides = [1, 1, 1, 1]} : vector<10x2x8x128xf32> to vector<10x1x8x128xf32>
    %10 = vector.shape_cast %9 : vector<10x1x8x128xf32> to vector<10x8x128xf32>
    %11 = vector.extract_strided_slice %8 {offsets = [0, 1, 0, 0], sizes = [10, 1, 8, 128], strides = [1, 1, 1, 1]} : vector<10x2x8x128xf32> to vector<10x1x8x128xf32>
    %12 = vector.shape_cast %11 : vector<10x1x8x128xf32> to vector<10x8x128xf32>
    %13 = arith.maximumf %10, %12 : vector<10x8x128xf32>
    %14 = vector.shape_cast %13 : vector<10x8x128xf32> to vector<80x128xf32>
    %cst_6 = arith.constant 0.000000e+00 : f32
    %15 = vector.broadcast %cst_6 : f32 to vector<8x128xf32>
    %16 = tpu.concatenate %15, %14, %15 in 0 : vector<8x128xf32>, vector<80x128xf32>, vector<8x128xf32> -> vector<96x128xf32>
    %c0_7 = arith.constant 0 : index
    %c0_8 = arith.constant 0 : index
    %17 = vector.load %arg4[%c0_7, %c0_8] : memref<160x96xf32, #tpu.memory_space<vmem>>, vector<160x96xf32>
    %cst_9 = arith.constant dense<0.000000e+00> : vector<160x128xf32>
    %18 = tpu.matmul %17, %16, %cst_9 {dimension_numbers = #tpu.dot_dimension_numbers<[1], [0], [0], [1], [0, 0, 1, 1], [], []>} : vector<160x96xf32>, vector<96x128xf32>, vector<160x128xf32> -> vector<160x128xf32>
    %c0_10 = arith.constant 0 : index
    %c0_11 = arith.constant 0 : index
    %19 = vector.load %arg5[%c0_10, %c0_11] : memref<160x1xf32, #tpu.memory_space<vmem>>, vector<160x1xf32>
    %20 = vector.broadcast %19 : vector<160x1xf32> to vector<160x128xf32>
    %21 = arith.addf %18, %20 : vector<160x128xf32>
    %cst_12 = arith.constant 0.000000e+00 : f32
    %22 = vector.broadcast %cst_12 : f32 to vector<160x128xf32>
    %23 = arith.maximumf %21, %22 : vector<160x128xf32>
    %24 = vector.shape_cast %23 : vector<160x128xf32> to vector<5x2x16x128xf32>
    %25 = vector.extract_strided_slice %24 {offsets = [0, 0, 0, 0], sizes = [5, 1, 16, 128], strides = [1, 1, 1, 1]} : vector<5x2x16x128xf32> to vector<5x1x16x128xf32>
    %26 = vector.shape_cast %25 : vector<5x1x16x128xf32> to vector<5x16x128xf32>
    %27 = vector.extract_strided_slice %24 {offsets = [0, 1, 0, 0], sizes = [5, 1, 16, 128], strides = [1, 1, 1, 1]} : vector<5x2x16x128xf32> to vector<5x1x16x128xf32>
    %28 = vector.shape_cast %27 : vector<5x1x16x128xf32> to vector<5x16x128xf32>
    %29 = arith.maximumf %26, %28 : vector<5x16x128xf32>
    %30 = vector.shape_cast %29 : vector<5x16x128xf32> to vector<80x128xf32>
    %c0_13 = arith.constant 0 : index
    %c0_14 = arith.constant 0 : index
    %31 = vector.load %arg6[%c0_13, %c0_14] : memref<1x80xf32, #tpu.memory_space<vmem>>, vector<1x80xf32>
    %cst_15 = arith.constant dense<0.000000e+00> : vector<1x128xf32>
    %32 = tpu.matmul %31, %30, %cst_15 {dimension_numbers = #tpu.dot_dimension_numbers<[1], [0], [0], [1], [0, 0, 1, 1], [], []>} : vector<1x80xf32>, vector<80x128xf32>, vector<1x128xf32> -> vector<1x128xf32>
    %c0_16 = arith.constant 0 : index
    %c0_17 = arith.constant 0 : index
    %33 = vector.load %arg7[%c0_16, %c0_17] : memref<1x1xf32, #tpu.memory_space<vmem>>, vector<1x1xf32>
    %34 = vector.broadcast %33 : vector<1x1xf32> to vector<1x128xf32>
    %35 = arith.addf %32, %34 : vector<1x128xf32>
    %c0_18 = arith.constant 0 : index
    %c0_19 = arith.constant 0 : index
    %36 = vector.load %arg8[%c0_18, %c0_19] : memref<1x128xf32, #tpu.memory_space<vmem>>, vector<1x128xf32>
    tpu.vector_store %arg8[%c0_18, %c0_19], %35 {strides = array<i32>} : memref<1x128xf32, #tpu.memory_space<vmem>>, vector<1x128xf32>,
    return
  }
  func.func @transform_0(%arg0: i32) -> (i32, i32) {
    %c0_i32 = arith.constant 0 : i32
    %c0_i32_0 = arith.constant 0 : i32
    return %c0_i32, %arg0 : i32, i32
  }
  func.func @transform_1(%arg0: i32) -> (i32, i32) {
    %c0_i32 = arith.constant 0 : i32
    %c0_i32_0 = arith.constant 0 : i32
    %c0_i32_1 = arith.constant 0 : i32
    return %c0_i32, %c0_i32_0 : i32, i32
  }
  func.func @transform_2(%arg0: i32) -> (i32, i32) {
    %c0_i32 = arith.constant 0 : i32
    %c0_i32_0 = arith.constant 0 : i32
    %c0_i32_1 = arith.constant 0 : i32
    return %c0_i32, %c0_i32_0 : i32, i32
  }
  func.func @transform_3(%arg0: i32) -> (i32, i32) {
    %c0_i32 = arith.constant 0 : i32
    %c0_i32_0 = arith.constant 0 : i32
    %c0_i32_1 = arith.constant 0 : i32
    return %c0_i32, %c0_i32_0 : i32, i32
  }
  func.func @transform_4(%arg0: i32) -> (i32, i32) {
    %c0_i32 = arith.constant 0 : i32
    %c0_i32_0 = arith.constant 0 : i32
    %c0_i32_1 = arith.constant 0 : i32
    return %c0_i32, %c0_i32_0 : i32, i32
  }
  func.func @transform_5(%arg0: i32) -> (i32, i32) {
    %c0_i32 = arith.constant 0 : i32
    %c0_i32_0 = arith.constant 0 : i32
    %c0_i32_1 = arith.constant 0 : i32
    return %c0_i32, %c0_i32_0 : i32, i32
  }
  func.func @transform_6(%arg0: i32) -> (i32, i32) {
    %c0_i32 = arith.constant 0 : i32
    %c0_i32_0 = arith.constant 0 : i32
    %c0_i32_1 = arith.constant 0 : i32
    return %c0_i32, %c0_i32_0 : i32, i32
  }
  func.func @transform_7(%arg0: i32) -> (i32, i32) {
    %c0_i32 = arith.constant 0 : i32
    %c0_i32_0 = arith.constant 0 : i32
    return %c0_i32, %arg0 : i32, i32
  }
}

</mosaic_0001>

<bundles_post_ra>
// kernel: tile.13
= control target key start
LH: loop header
LB: loop body
LE: loop exit
PB: predicated region body
PF: predicated region fallthrough
CT: control target
= control target key end

     0   :  { %s34_s0 = inlined_call_operand.vmem [shape: f32[8], index: 0, kind: input, shape index: {}]   ;;  %s35_s1 = inlined_call_operand.vmem [shape: f32[20,8], index: 1, kind: output, shape index: {}]  }
   0x1   :  { %v4_v0 = vld [vmem:[%s34_s0] ss:$0 sm:$0xff] }
   0x2   :  { %5 = vst [vmem:[%s35_s1] sm:$0xff] %v4_v0  ;;  %10 = vst [vmem:[%s35_s1 + $0x8] sm:$0xff] %v4_v0 }
   0x3   :  { %11 = vst [vmem:[%s35_s1 + $0x10] sm:$0xff] %v4_v0 }

// kernel: tile.0
= control target key start
LH: loop header
LB: loop body
LE: loop exit
PB: predicated region body
PF: predicated region fallthrough
CT: control target
= control target key end

     0   :  { %vm3_vm0 = vcmask 7168   ;;  %s247_s12 = smov 127   ;;  %s248_s21 = smov 126   ;;  %s454_s0 = inlined_call_operand.vmem [shape: f32[20,8], index: 0, kind: input, shape index: {}]   ;;  %s455_s1 = inlined_call_operand.vmem [shape: f32[160,1], index: 1, kind: output, shape index: {}]  }
   0x1   :  { %v18_v0 = vld [vmem:[%s454_s0] sm:$0xff]   ;;  %v196_v1 = vld [vmem:[%s454_s0 + $0x10] sm:$0xf]   ;;  %v193_v2 = vld [vmem:[%s454_s0 + $0x8] sm:$0xff]   ;;  %s249_s24 = smov 125   ;;  %s250_s27 = smov 124  }
   0x2   :  { %19 = vrot.lane.b32.xlu0 %v18_v0, %s247_s12  ;;  %37 = vrot.lane.b32.xlu1 %v196_v1, %s247_s12  ;;  %4 = vst.msk [vmem:[%s455_s1] ss:$8 sm:$0xf] %vm3_vm0, %v18_v0   ;;  %5 = vst.msk [vmem:[%s455_s1] ss:$8 sm:$0xf0] %vm3_vm0, %v18_v0  }
   0x3   :  { %187 = vst.msk [vmem:[%s455_s1 + $0x40] ss:$8 sm:$0xf] %vm3_vm0, %v193_v2   ;;  %188 = vst.msk [vmem:[%s455_s1 + $0x40] ss:$8 sm:$0xf0] %vm3_vm0, %v193_v2  }
   0x4   :  { %v203_v3 = vld [vmem:[%s454_s0 + $0x10] sm:$0xf]   ;;  %s251_s30 = smov 123   ;;  %s252_s8 = smov 122  }
   0x5   :  { %v210_v4 = vld [vmem:[%s454_s0 + $0x10] sm:$0xf]   ;;  %s253_s11 = smov 121  }
   0x6   :  { %28 = vrot.lane.b32.xlu0 %v193_v2, %s247_s12  ;;  %43 = vrot.lane.b32.xlu1 %v18_v0, %s248_s21  ;;  %v217_v5 = vld [vmem:[%s454_s0 + $0x10] sm:$0xf]  }
   0x7   :  { %v224_v6 = vld [vmem:[%s454_s0 + $0x10] sm:$0xf]  }
   0x8   :  { %v189_v7 = vld [vmem:[%s454_s0 + $0x10] sm:$0xf]  }
   0x9   :  { %190 = vst.msk [vmem:[%s455_s1 + $0x80] ss:$8 sm:$0xf] %vm3_vm0, %v189_v7   ;;  %v231_v8 = vld [vmem:[%s454_s0 + $0x10] sm:$0xf]  }
   0xa   :  { %52 = vrot.lane.b32.xlu0 %v193_v2, %s248_s21  ;;  %61 = vrot.lane.b32.xlu1 %v203_v3, %s248_s21  ;;  %v238_v9 = vld [vmem:[%s454_s0 + $0x10] sm:$0xf]  }
   0xe   :  { %67 = vrot.lane.b32.xlu0 %v18_v0, %s249_s24  ;;  %76 = vrot.lane.b32.xlu1 %v193_v2, %s249_s24 }
  0x12   :  { %85 = vrot.lane.b32.xlu0 %v210_v4, %s249_s24  ;;  %91 = vrot.lane.b32.xlu1 %v18_v0, %s250_s27 }
  0x16   :  { %100 = vrot.lane.b32.xlu0 %v193_v2, %s250_s27  ;;  %109 = vrot.lane.b32.xlu1 %v217_v5, %s250_s27 }
  0x1a   :  { %115 = vrot.lane.b32.xlu0 %v18_v0, %s251_s30  ;;  %124 = vrot.lane.b32.xlu1 %v193_v2, %s251_s30 }
  0x1e   :  { %133 = vrot.lane.b32.xlu0 %v224_v6, %s251_s30  ;;  %139 = vrot.lane.b32.xlu1 %v18_v0, %s252_s8 }
  0x22   :  { %148 = vrot.lane.b32.xlu0 %v193_v2, %s252_s8  ;;  %157 = vrot.lane.b32.xlu1 %v231_v8, %s252_s8 }
  0x26   :  { %163 = vrot.lane.b32.xlu0 %v18_v0, %s253_s11  ;;  %172 = vrot.lane.b32.xlu1 %v193_v2, %s253_s11 }
  0x2a   :  { %181 = vrot.lane.b32.xlu0 %v238_v9, %s253_s11 }
  0x74   :  { %v20_v10 = vpop.permute.xlu0 %19   ;;  %v38_v11 = vpop.permute.xlu1 %37  }
  0x75   :  { %191 = vst.msk [vmem:[%s455_s1 + $0x1] ss:$8 sm:$0xf] %vm3_vm0, %v20_v10   ;;  %192 = vst.msk [vmem:[%s455_s1 + $0x1] ss:$8 sm:$0xf0] %vm3_vm0, %v20_v10  }
  0x76   :  { %197 = vst.msk [vmem:[%s455_s1 + $0x81] ss:$8 sm:$0xf] %vm3_vm0, %v38_v11  }
  0x78   :  { %v29_v12 = vpop.permute.xlu0 %28   ;;  %v44_v13 = vpop.permute.xlu1 %43  }
  0x79   :  { %194 = vst.msk [vmem:[%s455_s1 + $0x41] ss:$8 sm:$0xf] %vm3_vm0, %v29_v12   ;;  %195 = vst.msk [vmem:[%s455_s1 + $0x41] ss:$8 sm:$0xf0] %vm3_vm0, %v29_v12  }
  0x7a   :  { %198 = vst.msk [vmem:[%s455_s1 + $0x2] ss:$8 sm:$0xf] %vm3_vm0, %v44_v13   ;;  %199 = vst.msk [vmem:[%s455_s1 + $0x2] ss:$8 sm:$0xf0] %vm3_vm0, %v44_v13  }
  0x7c   :  { %v53_v14 = vpop.permute.xlu0 %52   ;;  %v62_v15 = vpop.permute.xlu1 %61  }
  0x7d   :  { %201 = vst.msk [vmem:[%s455_s1 + $0x42] ss:$8 sm:$0xf] %vm3_vm0, %v53_v14   ;;  %202 = vst.msk [vmem:[%s455_s1 + $0x42] ss:$8 sm:$0xf0] %vm3_vm0, %v53_v14  }
  0x7e   :  { %204 = vst.msk [vmem:[%s455_s1 + $0x82] ss:$8 sm:$0xf] %vm3_vm0, %v62_v15  }
  0x80   :  { %v68_v16 = vpop.permute.xlu0 %67   ;;  %v77_v17 = vpop.permute.xlu1 %76  }
  0x81   :  { %205 = vst.msk [vmem:[%s455_s1 + $0x3] ss:$8 sm:$0xf] %vm3_vm0, %v68_v16   ;;  %206 = vst.msk [vmem:[%s455_s1 + $0x3] ss:$8 sm:$0xf0] %vm3_vm0, %v68_v16  }
  0x82   :  { %208 = vst.msk [vmem:[%s455_s1 + $0x43] ss:$8 sm:$0xf] %vm3_vm0, %v77_v17   ;;  %209 = vst.msk [vmem:[%s455_s1 + $0x43] ss:$8 sm:$0xf0] %vm3_vm0, %v77_v17  }
  0x84   :  { %v86_v18 = vpop.permute.xlu0 %85   ;;  %v92_v19 = vpop.permute.xlu1 %91  }
  0x85   :  { %211 = vst.msk [vmem:[%s455_s1 + $0x83] ss:$8 sm:$0xf] %vm3_vm0, %v86_v18   ;;  %212 = vst.msk [vmem:[%s455_s1 + $0x4] ss:$8 sm:$0xf] %vm3_vm0, %v92_v19  }
  0x86   :  { %213 = vst.msk [vmem:[%s455_s1 + $0x4] ss:$8 sm:$0xf0] %vm3_vm0, %v92_v19  }
  0x88   :  { %v101_v20 = vpop.permute.xlu0 %100   ;;  %v110_v21 = vpop.permute.xlu1 %109  }
  0x89   :  { %215 = vst.msk [vmem:[%s455_s1 + $0x44] ss:$8 sm:$0xf] %vm3_vm0, %v101_v20   ;;  %216 = vst.msk [vmem:[%s455_s1 + $0x44] ss:$8 sm:$0xf0] %vm3_vm0, %v101_v20  }
  0x8a   :  { %218 = vst.msk [vmem:[%s455_s1 + $0x84] ss:$8 sm:$0xf] %vm3_vm0, %v110_v21  }
  0x8c   :  { %v116_v22 = vpop.permute.xlu0 %115   ;;  %v125_v23 = vpop.permute.xlu1 %124  }
  0x8d   :  { %219 = vst.msk [vmem:[%s455_s1 + $0x5] ss:$8 sm:$0xf] %vm3_vm0, %v116_v22   ;;  %220 = vst.msk [vmem:[%s455_s1 + $0x5] ss:$8 sm:$0xf0] %vm3_vm0, %v116_v22  }
  0x8e   :  { %222 = vst.msk [vmem:[%s455_s1 + $0x45] ss:$8 sm:$0xf] %vm3_vm0, %v125_v23   ;;  %223 = vst.msk [vmem:[%s455_s1 + $0x45] ss:$8 sm:$0xf0] %vm3_vm0, %v125_v23  }
  0x90   :  { %v134_v24 = vpop.permute.xlu0 %133   ;;  %v140_v25 = vpop.permute.xlu1 %139  }
  0x91   :  { %225 = vst.msk [vmem:[%s455_s1 + $0x85] ss:$8 sm:$0xf] %vm3_vm0, %v134_v24   ;;  %226 = vst.msk [vmem:[%s455_s1 + $0x6] ss:$8 sm:$0xf] %vm3_vm0, %v140_v25  }
  0x92   :  { %227 = vst.msk [vmem:[%s455_s1 + $0x6] ss:$8 sm:$0xf0] %vm3_vm0, %v140_v25  }
  0x94   :  { %v149_v26 = vpop.permute.xlu0 %148   ;;  %v158_v27 = vpop.permute.xlu1 %157  }
  0x95   :  { %229 = vst.msk [vmem:[%s455_s1 + $0x46] ss:$8 sm:$0xf] %vm3_vm0, %v149_v26   ;;  %230 = vst.msk [vmem:[%s455_s1 + $0x46] ss:$8 sm:$0xf0] %vm3_vm0, %v149_v26  }
  0x96   :  { %232 = vst.msk [vmem:[%s455_s1 + $0x86] ss:$8 sm:$0xf] %vm3_vm0, %v158_v27  }
  0x98   :  { %v164_v28 = vpop.permute.xlu0 %163   ;;  %v173_v29 = vpop.permute.xlu1 %172  }
  0x99   :  { %233 = vst.msk [vmem:[%s455_s1 + $0x7] ss:$8 sm:$0xf] %vm3_vm0, %v164_v28   ;;  %234 = vst.msk [vmem:[%s455_s1 + $0x7] ss:$8 sm:$0xf0] %vm3_vm0, %v164_v28  }
  0x9a   :  { %236 = vst.msk [vmem:[%s455_s1 + $0x47] ss:$8 sm:$0xf] %vm3_vm0, %v173_v29   ;;  %237 = vst.msk [vmem:[%s455_s1 + $0x47] ss:$8 sm:$0xf0] %vm3_vm0, %v173_v29  }
  0x9c   :  { %v182_v30 = vpop.permute.xlu0 %181  }
  0x9d   :  { %239 = vst.msk [vmem:[%s455_s1 + $0x87] ss:$8 sm:$0xf] %vm3_vm0, %v182_v30  }

// kernel: tile.18
= control target key start
LH: loop header
LB: loop body
LE: loop exit
PB: predicated region body
PF: predicated region fallthrough
CT: control target
= control target key end

     0   :  { %s28_s0 = inlined_call_operand.vmem [shape: f32[16], index: 0, kind: input, shape index: {}]   ;;  %s29_s1 = inlined_call_operand.vmem [shape: f32[10,16], index: 1, kind: output, shape index: {}]  }
   0x1   :  { %v4_v0 = vld [vmem:[%s28_s0] ss:$0 sm:$0xff] }
   0x2   :  { %5 = vst [vmem:[%s29_s1] sm:$0xff] %v4_v0  ;;  %8 = vst [vmem:[%s29_s1 + $0x8] sm:$0xff] %v4_v0 }

// kernel: tile.1
= control target key start
LH: loop header
LB: loop body
LE: loop exit
PB: predicated region body
PF: predicated region fallthrough
CT: control target
= control target key end

     0   :  { %vm3_vm0 = vcmask 7168   ;;  %s405_s8 = smov 126   ;;  %s406_s9 = smov 127   ;;  %s822_s0 = inlined_call_operand.vmem [shape: f32[10,16], index: 0, kind: input, shape index: {}]   ;;  %s823_s1 = inlined_call_operand.vmem [shape: f32[160,1], index: 1, kind: output, shape index: {}]  }
   0x1   :  { %v433_v0 = vld [vmem:[%s822_s0] sm:$0xff]   ;;  %v310_v1 = vld [vmem:[%s822_s0 + $0x8] sm:$0x3]   ;;  %s407_s24 = smov 125   ;;  %s408_s27 = smov 124  }
   0x2   :  { %33 = vrot.lane.b32.xlu1 %v433_v0, %s405_s8  ;;  %14 = vrot.lane.b32.xlu0 %v433_v0, %s406_s9  ;;  %4 = vst.msk [vmem:[%s823_s1] ss:$16 sm:$0x3] %vm3_vm0, %v433_v0   ;;  %5 = vst.msk [vmem:[%s823_s1] ss:$16 sm:$0xc] %vm3_vm0, %v433_v0  }
   0x3   :  { %6 = vst.msk [vmem:[%s823_s1] ss:$16 sm:$0x30] %vm3_vm0, %v433_v0   ;;  %7 = vst.msk [vmem:[%s823_s1] ss:$16 sm:$0xc0] %vm3_vm0, %v433_v0  }
   0x4   :  { %v304_v2 = vld [vmem:[%s822_s0 + $0x8] sm:$0x3]   ;;  %s409_s30 = smov 123   ;;  %s410_s4 = smov 122  }
   0x5   :  { %v316_v3 = vld [vmem:[%s822_s0 + $0x8] sm:$0x3]   ;;  %s411_s7 = smov 121   ;;  %s412_s10 = smov 120  }
   0x6   :  { %46 = vrot.lane.b32.xlu1 %v310_v1, %s405_s8  ;;  %27 = vrot.lane.b32.xlu0 %v304_v2, %s406_s9  ;;  %v322_v4 = vld [vmem:[%s822_s0 + $0x8] sm:$0x3]   ;;  %s413_s13 = smov 119   ;;  %s414_s16 = smov 118  }
   0x7   :  { %v328_v5 = vld [vmem:[%s822_s0 + $0x8] sm:$0x3]   ;;  %s415_s19 = smov 117   ;;  %s416_s26 = smov 116  }
   0x8   :  { %v334_v6 = vld [vmem:[%s822_s0 + $0x8] sm:$0x3]   ;;  %s417_s29 = smov 115   ;;  %s418_s3 = smov 114  }
   0x9   :  { %v340_v7 = vld [vmem:[%s822_s0 + $0x8] sm:$0x3]  }
   0xa   :  { %65 = vrot.lane.b32.xlu1 %v316_v3, %s407_s24  ;;  %52 = vrot.lane.b32.xlu0 %v433_v0, %s407_s24  ;;  %v346_v8 = vld [vmem:[%s822_s0 + $0x8] sm:$0x3]  }
   0xb   :  { %v352_v9 = vld [vmem:[%s822_s0 + $0x8] sm:$0x3]  }
   0xc   :  { %v358_v10 = vld [vmem:[%s822_s0 + $0x8] sm:$0x3]  }
   0xd   :  { %v364_v11 = vld [vmem:[%s822_s0 + $0x8] sm:$0x3]  }
   0xe   :  { %84 = vrot.lane.b32.xlu1 %v322_v4, %s408_s27  ;;  %71 = vrot.lane.b32.xlu0 %v433_v0, %s408_s27  ;;  %v370_v12 = vld [vmem:[%s822_s0 + $0x8] sm:$0x3]  }
   0xf   :  { %v298_v13 = vld [vmem:[%s822_s0 + $0x8] sm:$0x3]  }
  0x10   :  { %299 = vst.msk [vmem:[%s823_s1 + $0x80] ss:$16 sm:$0x3] %vm3_vm0, %v298_v13   ;;  %v376_v14 = vld [vmem:[%s822_s0 + $0x8] sm:$0x3]  }
  0x11   :  { %v382_v15 = vld [vmem:[%s822_s0 + $0x8] sm:$0x3]  }
  0x12   :  { %103 = vrot.lane.b32.xlu1 %v328_v5, %s409_s30  ;;  %90 = vrot.lane.b32.xlu0 %v433_v0, %s409_s30  ;;  %v388_v16 = vld [vmem:[%s822_s0 + $0x8] sm:$0x3]   ;;  %s419_s0 = smov 113  }
  0x16   :  { %122 = vrot.lane.b32.xlu1 %v334_v6, %s410_s4  ;;  %109 = vrot.lane.b32.xlu0 %v433_v0, %s410_s4 }
  0x1a   :  { %141 = vrot.lane.b32.xlu1 %v340_v7, %s411_s7  ;;  %128 = vrot.lane.b32.xlu0 %v433_v0, %s411_s7 }
  0x1e   :  { %160 = vrot.lane.b32.xlu1 %v346_v8, %s412_s10  ;;  %147 = vrot.lane.b32.xlu0 %v433_v0, %s412_s10 }
  0x22   :  { %179 = vrot.lane.b32.xlu1 %v352_v9, %s413_s13  ;;  %166 = vrot.lane.b32.xlu0 %v433_v0, %s413_s13 }
  0x26   :  { %198 = vrot.lane.b32.xlu1 %v358_v10, %s414_s16  ;;  %185 = vrot.lane.b32.xlu0 %v433_v0, %s414_s16 }
  0x2a   :  { %217 = vrot.lane.b32.xlu1 %v364_v11, %s415_s19  ;;  %204 = vrot.lane.b32.xlu0 %v433_v0, %s415_s19 }
  0x2e   :  { %236 = vrot.lane.b32.xlu1 %v370_v12, %s416_s26  ;;  %223 = vrot.lane.b32.xlu0 %v433_v0, %s416_s26 }
  0x32   :  { %255 = vrot.lane.b32.xlu1 %v376_v14, %s417_s29  ;;  %242 = vrot.lane.b32.xlu0 %v433_v0, %s417_s29 }
  0x36   :  { %274 = vrot.lane.b32.xlu1 %v382_v15, %s418_s3  ;;  %261 = vrot.lane.b32.xlu0 %v433_v0, %s418_s3 }
  0x3a   :  { %293 = vrot.lane.b32.xlu1 %v388_v16, %s419_s0  ;;  %280 = vrot.lane.b32.xlu0 %v433_v0, %s419_s0 }
  0x74   :  { %v34_v17 = vpop.permute.xlu1 %33   ;;  %v15_v18 = vpop.permute.xlu0 %14  }
  0x75   :  { %306 = vst.msk [vmem:[%s823_s1 + $0x2] ss:$16 sm:$0x3] %vm3_vm0, %v34_v17   ;;  %307 = vst.msk [vmem:[%s823_s1 + $0x2] ss:$16 sm:$0xc] %vm3_vm0, %v34_v17  }
  0x76   :  { %308 = vst.msk [vmem:[%s823_s1 + $0x2] ss:$16 sm:$0x30] %vm3_vm0, %v34_v17   ;;  %309 = vst.msk [vmem:[%s823_s1 + $0x2] ss:$16 sm:$0xc0] %vm3_vm0, %v34_v17  }
  0x77   :  { %300 = vst.msk [vmem:[%s823_s1 + $0x1] ss:$16 sm:$0x3] %vm3_vm0, %v15_v18   ;;  %301 = vst.msk [vmem:[%s823_s1 + $0x1] ss:$16 sm:$0xc] %vm3_vm0, %v15_v18  }
  0x78   :  { %302 = vst.msk [vmem:[%s823_s1 + $0x1] ss:$16 sm:$0x30] %vm3_vm0, %v15_v18   ;;  %303 = vst.msk [vmem:[%s823_s1 + $0x1] ss:$16 sm:$0xc0] %vm3_vm0, %v15_v18   ;;  %v47_v19 = vpop.permute.xlu1 %46   ;;  %v28_v20 = vpop.permute.xlu0 %27  }
  0x79   :  { %311 = vst.msk [vmem:[%s823_s1 + $0x82] ss:$16 sm:$0x3] %vm3_vm0, %v47_v19   ;;  %305 = vst.msk [vmem:[%s823_s1 + $0x81] ss:$16 sm:$0x3] %vm3_vm0, %v28_v20  }
  0x7c   :  { %v66_v21 = vpop.permute.xlu1 %65   ;;  %v53_v22 = vpop.permute.xlu0 %52  }
  0x7d   :  { %317 = vst.msk [vmem:[%s823_s1 + $0x83] ss:$16 sm:$0x3] %vm3_vm0, %v66_v21   ;;  %312 = vst.msk [vmem:[%s823_s1 + $0x3] ss:$16 sm:$0x3] %vm3_vm0, %v53_v22  }
  0x7e   :  { %313 = vst.msk [vmem:[%s823_s1 + $0x3] ss:$16 sm:$0xc] %vm3_vm0, %v53_v22   ;;  %314 = vst.msk [vmem:[%s823_s1 + $0x3] ss:$16 sm:$0x30] %vm3_vm0, %v53_v22  }
  0x7f   :  { %315 = vst.msk [vmem:[%s823_s1 + $0x3] ss:$16 sm:$0xc0] %vm3_vm0, %v53_v22  }
  0x80   :  { %v85_v23 = vpop.permute.xlu1 %84   ;;  %v72_v24 = vpop.permute.xlu0 %71  }
  0x81   :  { %323 = vst.msk [vmem:[%s823_s1 + $0x84] ss:$16 sm:$0x3] %vm3_vm0, %v85_v23   ;;  %318 = vst.msk [vmem:[%s823_s1 + $0x4] ss:$16 sm:$0x3] %vm3_vm0, %v72_v24  }
  0x82   :  { %319 = vst.msk [vmem:[%s823_s1 + $0x4] ss:$16 sm:$0xc] %vm3_vm0, %v72_v24   ;;  %320 = vst.msk [vmem:[%s823_s1 + $0x4] ss:$16 sm:$0x30] %vm3_vm0, %v72_v24  }
  0x83   :  { %321 = vst.msk [vmem:[%s823_s1 + $0x4] ss:$16 sm:$0xc0] %vm3_vm0, %v72_v24  }
  0x84   :  { %v104_v25 = vpop.permute.xlu1 %103   ;;  %v91_v26 = vpop.permute.xlu0 %90  }
  0x85   :  { %329 = vst.msk [vmem:[%s823_s1 + $0x85] ss:$16 sm:$0x3] %vm3_vm0, %v104_v25   ;;  %324 = vst.msk [vmem:[%s823_s1 + $0x5] ss:$16 sm:$0x3] %vm3_vm0, %v91_v26  }
  0x86   :  { %325 = vst.msk [vmem:[%s823_s1 + $0x5] ss:$16 sm:$0xc] %vm3_vm0, %v91_v26   ;;  %326 = vst.msk [vmem:[%s823_s1 + $0x5] ss:$16 sm:$0x30] %vm3_vm0, %v91_v26  }
  0x87   :  { %327 = vst.msk [vmem:[%s823_s1 + $0x5] ss:$16 sm:$0xc0] %vm3_vm0, %v91_v26  }
  0x88   :  { %v123_v27 = vpop.permute.xlu1 %122   ;;  %v110_v28 = vpop.permute.xlu0 %109  }
  0x89   :  { %335 = vst.msk [vmem:[%s823_s1 + $0x86] ss:$16 sm:$0x3] %vm3_vm0, %v123_v27   ;;  %330 = vst.msk [vmem:[%s823_s1 + $0x6] ss:$16 sm:$0x3] %vm3_vm0, %v110_v28  }
  0x8a   :  { %331 = vst.msk [vmem:[%s823_s1 + $0x6] ss:$16 sm:$0xc] %vm3_vm0, %v110_v28   ;;  %332 = vst.msk [vmem:[%s823_s1 + $0x6] ss:$16 sm:$0x30] %vm3_vm0, %v110_v28  }
  0x8b   :  { %333 = vst.msk [vmem:[%s823_s1 + $0x6] ss:$16 sm:$0xc0] %vm3_vm0, %v110_v28  }
  0x8c   :  { %v142_v29 = vpop.permute.xlu1 %141   ;;  %v129_v30 = vpop.permute.xlu0 %128  }
  0x8d   :  { %341 = vst.msk [vmem:[%s823_s1 + $0x87] ss:$16 sm:$0x3] %vm3_vm0, %v142_v29   ;;  %336 = vst.msk [vmem:[%s823_s1 + $0x7] ss:$16 sm:$0x3] %vm3_vm0, %v129_v30  }
  0x8e   :  { %337 = vst.msk [vmem:[%s823_s1 + $0x7] ss:$16 sm:$0xc] %vm3_vm0, %v129_v30   ;;  %338 = vst.msk [vmem:[%s823_s1 + $0x7] ss:$16 sm:$0x30] %vm3_vm0, %v129_v30  }
  0x8f   :  { %339 = vst.msk [vmem:[%s823_s1 + $0x7] ss:$16 sm:$0xc0] %vm3_vm0, %v129_v30  }
  0x90   :  { %v161_v31 = vpop.permute.xlu1 %160   ;;  %v148_v32 = vpop.permute.xlu0 %147  }
  0x91   :  { %347 = vst.msk [vmem:[%s823_s1 + $0x88] ss:$16 sm:$0x3] %vm3_vm0, %v161_v31   ;;  %342 = vst.msk [vmem:[%s823_s1 + $0x8] ss:$16 sm:$0x3] %vm3_vm0, %v148_v32  }
  0x92   :  { %343 = vst.msk [vmem:[%s823_s1 + $0x8] ss:$16 sm:$0xc] %vm3_vm0, %v148_v32   ;;  %344 = vst.msk [vmem:[%s823_s1 + $0x8] ss:$16 sm:$0x30] %vm3_vm0, %v148_v32  }
  0x93   :  { %345 = vst.msk [vmem:[%s823_s1 + $0x8] ss:$16 sm:$0xc0] %vm3_vm0, %v148_v32  }
  0x94   :  { %v180_v33 = vpop.permute.xlu1 %179   ;;  %v167_v34 = vpop.permute.xlu0 %166  }
  0x95   :  { %353 = vst.msk [vmem:[%s823_s1 + $0x89] ss:$16 sm:$0x3] %vm3_vm0, %v180_v33   ;;  %348 = vst.msk [vmem:[%s823_s1 + $0x9] ss:$16 sm:$0x3] %vm3_vm0, %v167_v34  }
  0x96   :  { %349 = vst.msk [vmem:[%s823_s1 + $0x9] ss:$16 sm:$0xc] %vm3_vm0, %v167_v34   ;;  %350 = vst.msk [vmem:[%s823_s1 + $0x9] ss:$16 sm:$0x30] %vm3_vm0, %v167_v34  }
  0x97   :  { %351 = vst.msk [vmem:[%s823_s1 + $0x9] ss:$16 sm:$0xc0] %vm3_vm0, %v167_v34  }
  0x98   :  { %v199_v35 = vpop.permute.xlu1 %198   ;;  %v186_v36 = vpop.permute.xlu0 %185  }
  0x99   :  { %359 = vst.msk [vmem:[%s823_s1 + $0x8a] ss:$16 sm:$0x3] %vm3_vm0, %v199_v35   ;;  %354 = vst.msk [vmem:[%s823_s1 + $0xa] ss:$16 sm:$0x3] %vm3_vm0, %v186_v36  }
  0x9a   :  { %355 = vst.msk [vmem:[%s823_s1 + $0xa] ss:$16 sm:$0xc] %vm3_vm0, %v186_v36   ;;  %356 = vst.msk [vmem:[%s823_s1 + $0xa] ss:$16 sm:$0x30] %vm3_vm0, %v186_v36  }
  0x9b   :  { %357 = vst.msk [vmem:[%s823_s1 + $0xa] ss:$16 sm:$0xc0] %vm3_vm0, %v186_v36  }
  0x9c   :  { %v218_v37 = vpop.permute.xlu1 %217   ;;  %v205_v38 = vpop.permute.xlu0 %204  }
  0x9d   :  { %365 = vst.msk [vmem:[%s823_s1 + $0x8b] ss:$16 sm:$0x3] %vm3_vm0, %v218_v37   ;;  %360 = vst.msk [vmem:[%s823_s1 + $0xb] ss:$16 sm:$0x3] %vm3_vm0, %v205_v38  }
  0x9e   :  { %361 = vst.msk [vmem:[%s823_s1 + $0xb] ss:$16 sm:$0xc] %vm3_vm0, %v205_v38   ;;  %362 = vst.msk [vmem:[%s823_s1 + $0xb] ss:$16 sm:$0x30] %vm3_vm0, %v205_v38  }
  0x9f   :  { %363 = vst.msk [vmem:[%s823_s1 + $0xb] ss:$16 sm:$0xc0] %vm3_vm0, %v205_v38  }
  0xa0   :  { %v237_v39 = vpop.permute.xlu1 %236   ;;  %v224_v40 = vpop.permute.xlu0 %223  }
  0xa1   :  { %371 = vst.msk [vmem:[%s823_s1 + $0x8c] ss:$16 sm:$0x3] %vm3_vm0, %v237_v39   ;;  %366 = vst.msk [vmem:[%s823_s1 + $0xc] ss:$16 sm:$0x3] %vm3_vm0, %v224_v40  }
  0xa2   :  { %367 = vst.msk [vmem:[%s823_s1 + $0xc] ss:$16 sm:$0xc] %vm3_vm0, %v224_v40   ;;  %368 = vst.msk [vmem:[%s823_s1 + $0xc] ss:$16 sm:$0x30] %vm3_vm0, %v224_v40  }
  0xa3   :  { %369 = vst.msk [vmem:[%s823_s1 + $0xc] ss:$16 sm:$0xc0] %vm3_vm0, %v224_v40  }
  0xa4   :  { %v256_v41 = vpop.permute.xlu1 %255   ;;  %v243_v42 = vpop.permute.xlu0 %242  }
  0xa5   :  { %377 = vst.msk [vmem:[%s823_s1 + $0x8d] ss:$16 sm:$0x3] %vm3_vm0, %v256_v41   ;;  %372 = vst.msk [vmem:[%s823_s1 + $0xd] ss:$16 sm:$0x3] %vm3_vm0, %v243_v42  }
  0xa6   :  { %373 = vst.msk [vmem:[%s823_s1 + $0xd] ss:$16 sm:$0xc] %vm3_vm0, %v243_v42   ;;  %374 = vst.msk [vmem:[%s823_s1 + $0xd] ss:$16 sm:$0x30] %vm3_vm0, %v243_v42  }
  0xa7   :  { %375 = vst.msk [vmem:[%s823_s1 + $0xd] ss:$16 sm:$0xc0] %vm3_vm0, %v243_v42  }
  0xa8   :  { %v275_v43 = vpop.permute.xlu1 %274   ;;  %v262_v44 = vpop.permute.xlu0 %261  }
  0xa9   :  { %383 = vst.msk [vmem:[%s823_s1 + $0x8e] ss:$16 sm:$0x3] %vm3_vm0, %v275_v43   ;;  %378 = vst.msk [vmem:[%s823_s1 + $0xe] ss:$16 sm:$0x3] %vm3_vm0, %v262_v44  }
  0xaa   :  { %379 = vst.msk [vmem:[%s823_s1 + $0xe] ss:$16 sm:$0xc] %vm3_vm0, %v262_v44   ;;  %380 = vst.msk [vmem:[%s823_s1 + $0xe] ss:$16 sm:$0x30] %vm3_vm0, %v262_v44  }
  0xab   :  { %381 = vst.msk [vmem:[%s823_s1 + $0xe] ss:$16 sm:$0xc0] %vm3_vm0, %v262_v44  }
  0xac   :  { %v294_v45 = vpop.permute.xlu1 %293   ;;  %v281_v46 = vpop.permute.xlu0 %280  }
  0xad   :  { %389 = vst.msk [vmem:[%s823_s1 + $0x8f] ss:$16 sm:$0x3] %vm3_vm0, %v294_v45   ;;  %384 = vst.msk [vmem:[%s823_s1 + $0xf] ss:$16 sm:$0x3] %vm3_vm0, %v281_v46  }
  0xae   :  { %385 = vst.msk [vmem:[%s823_s1 + $0xf] ss:$16 sm:$0xc] %vm3_vm0, %v281_v46   ;;  %386 = vst.msk [vmem:[%s823_s1 + $0xf] ss:$16 sm:$0x30] %vm3_vm0, %v281_v46  }
  0xaf   :  { %387 = vst.msk [vmem:[%s823_s1 + $0xf] ss:$16 sm:$0xc0] %vm3_vm0, %v281_v46  }

// kernel: flf_net_forward.1
= control target key start
LH: loop header
LB: loop body
LE: loop exit
PB: predicated region body
PF: predicated region fallthrough
CT: control target
= control target key end

     0   :  { %vm171_vm0 = vcmask 179200   ;;  %v1180_v2 = vmov 0   ;;  %vm232_vm1 = vcmask 1045504   ;;  %vm571_vm2 = vcmask 785408   ;;  %s1529_s0 = inlined_call_operand.vmem [shape: f32[22,128], index: 0, kind: input, shape index: {}]   ;;  %s1530_s1 = inlined_call_operand.vmem [shape: f32[160,22], index: 1, kind: input, shape index: {}]   ;;  %s1531_s2 = inlined_call_operand.vmem [shape: f32[160,1], index: 2, kind: input, shape index: {}]   ;;  %s1532_s6 = inlined_call_operand.<no memory space> [shape: f32[1,1], index: 6, kind: input, shape index: {}]   ;;  %s1533_s4 = inlined_call_operand.vmem [shape: f32[160,1], index: 4, kind: input, shape index: {}]   ;;  %s1534_s3 = inlined_call_operand.vmem [shape: f32[160,96], index: 3, kind: input, shape index: {}]   ;;  %s1535_s5 = inlined_call_operand.vmem [shape: f32[1,80], index: 5, kind: input, shape index: {}]   ;;  %s1536_s7 = inlined_call_operand.vmem [shape: f32[1,128], index: 7, kind: output, shape index: {}]  }
   0x1   :  { %v28_v0 = vld [vmem:[%s1529_s0] sm:$0xff]  ;;  %v29_v1 = vld [vmem:[%s1529_s0 + $0x8] sm:$0xff]  ;;  %1178 = vset.pattern.permute.xlu0 %v1180_v2  ;;  %1179 = vset.pattern.permute.xlu1 %v1180_v2  ;;  %v12_v3 = vstv %s1532_s6  ;;  %v30_v6 = vld [vmem:[%s1529_s0 + $0x10] sm:$0x3f]  ;;  %vm1183_vm3 = vmmov 0   ;;  %vm838_vm4 = vcmask 654336  }
   0x2   :  { %v1135_v4 = vpack.c.bf16 %v29_v1, %v28_v0  ;;  %v31_v5 = vld [vmem:[%s1530_s1] sm:$0xff]  ;;  %13 = vst [vmem:[#allocation2] sm:$0x1] %v12_v3  ;;  %v53_v8 = vld [vmem:[%s1531_s2 + $0x10] sm:$0xff]  ;;  %v52_v9 = vld [vmem:[%s1531_s2 + $0x8] sm:$0xff] }
   0x3   :  { %1030 = vmatprep.mubr.msk.f32.mxu0 %vm171_vm0, %v31_v5  ;;  %v51_v7 = vld [vmem:[%s1531_s2] sm:$0xff]  ;;  %83 = vperm.xlu1 %1179, %v53_v8   ;;  %v54_v10 = vld [vmem:[%s1531_s2 + $0x18] sm:$0xff]  ;;  %v32_v11 = vld [vmem:[%s1530_s1 + $0x8] sm:$0xff] }
   0x4   :  { %1136 = vmatprep.subr.bf16.mxu0 %v1135_v4  ;;  %73 = vperm.xlu0 %1178, %v51_v7   ;;  %v33_v12 = vld [vmem:[%s1530_s1 + $0x10] sm:$0xff]  ;;  %v55_v13 = vld [vmem:[%s1531_s2 + $0x20] sm:$0xff]  ;;  %v56_v14 = vld [vmem:[%s1531_s2 + $0x28] sm:$0xff] }
   0x5   :  { %1138 = vmatpush3.bf16.msra.mxu0 %v1135_v4  ;;  %v34_v15 = vld [vmem:[%s1530_s1 + $0x18] sm:$0xff]  ;;  %v35_v16 = vld [vmem:[%s1530_s1 + $0x20] sm:$0xff]  ;;  %v57_v17 = vld [vmem:[%s1531_s2 + $0x30] sm:$0xff] }
   0x6   :  { %1028 = vmatprep.subr.msk.mxu0 %vm232_vm1, %v30_v6  ;;  %v58_v18 = vld [vmem:[%s1531_s2 + $0x38] sm:$0xff]  ;;  %v36_v19 = vld [vmem:[%s1530_s1 + $0x28] sm:$0xff]  ;;  %v37_v20 = vld [vmem:[%s1530_s1 + $0x30] sm:$0xff] }
   0x7   :  { %88 = vperm.xlu1 %1179, %v54_v10   ;;  %v59_v21 = vld [vmem:[%s1531_s2 + $0x40] sm:$0xff]  ;;  %v60_v22 = vld [vmem:[%s1531_s2 + $0x48] sm:$0xff]  ;;  %v38_v23 = vld [vmem:[%s1530_s1 + $0x38] sm:$0xff] }
   0x8   :  { %78 = vperm.xlu0 %1178, %v52_v9   ;;  %v39_v24 = vld [vmem:[%s1530_s1 + $0x40] sm:$0xff]  ;;  %v61_v25 = vld [vmem:[%s1531_s2 + $0x50] sm:$0xff]  ;;  %v62_v26 = vld [vmem:[%s1531_s2 + $0x58] sm:$0xff] }
   0x9   :  { %1029 = vmatpush3.msk.msra.mxu0 %vm232_vm1, %v30_v6  ;;  %v40_v27 = vld [vmem:[%s1530_s1 + $0x48] sm:$0xff]  ;;  %v41_v28 = vld [vmem:[%s1530_s1 + $0x50] sm:$0xff]  ;;  %v63_v29 = vld [vmem:[%s1531_s2 + $0x60] sm:$0xff] }
   0xa   :  { %1031 = vmatmul.mubr.msk.f32.vlgmr.msra.gmra.mrb[0].mxu0 %vm171_vm0, %v32_v11  ;;  %v64_v30 = vld [vmem:[%s1531_s2 + $0x68] sm:$0xff]  ;;  %v42_v31 = vld [vmem:[%s1530_s1 + $0x58] sm:$0xff]  ;;  %v43_v32 = vld [vmem:[%s1530_s1 + $0x60] sm:$0xff] }
   0xb   :  { %1033 = vmatprep.mubr.msk.f32.mxu0 %vm171_vm0, %v33_v12  ;;  %98 = vperm.xlu1 %1179, %v56_v14   ;;  %v65_v33 = vld [vmem:[%s1531_s2 + $0x70] sm:$0xff]  ;;  %v66_v34 = vld [vmem:[%s1531_s2 + $0x78] sm:$0xff]  ;;  %v44_v35 = vld [vmem:[%s1530_s1 + $0x68] sm:$0xff] }
   0xc   :  { %93 = vperm.xlu0 %1178, %v55_v13   ;;  %v45_v36 = vld [vmem:[%s1530_s1 + $0x70] sm:$0xff]  ;;  %v67_v37 = vld [vmem:[%s1531_s2 + $0x80] sm:$0xff]  ;;  %v68_v38 = vld [vmem:[%s1531_s2 + $0x88] sm:$0xff] }
   0xd   :  { %v46_v39 = vld [vmem:[%s1530_s1 + $0x78] sm:$0xff]  ;;  %v47_v40 = vld [vmem:[%s1530_s1 + $0x80] sm:$0xff]  ;;  %v69_v41 = vld [vmem:[%s1531_s2 + $0x90] sm:$0xff] }
   0xe   :  { %1034 = vmatmul.mubr.msk.f32.gmra.mrb[2].mxu0 %vm171_vm0, %v34_v15  ;;  %v70_v42 = vld [vmem:[%s1531_s2 + $0x98] sm:$0xff]  ;;  %v48_v43 = vld [vmem:[%s1530_s1 + $0x88] sm:$0xff]  ;;  %v49_v44 = vld [vmem:[%s1530_s1 + $0x90] sm:$0xff] }
   0xf   :  { %1036 = vmatprep.mubr.msk.f32.mxu0 %vm171_vm0, %v35_v16  ;;  %108 = vperm.xlu1 %1179, %v58_v18   ;;  %v451_v45 = vld [vmem:[%s1533_s4] sm:$0xff]  ;;  %v452_v46 = vld [vmem:[%s1533_s4 + $0x8] sm:$0xff]  ;;  %v50_v47 = vld [vmem:[%s1530_s1 + $0x98] sm:$0xff] }
  0x10   :  { %103 = vperm.xlu0 %1178, %v57_v17   ;;  %v453_v48 = vld [vmem:[%s1533_s4 + $0x10] sm:$0xff]  ;;  %v454_v49 = vld [vmem:[%s1533_s4 + $0x18] sm:$0xff]  ;;  %v455_v50 = vld [vmem:[%s1533_s4 + $0x20] sm:$0xff] }
  0x11   :  { %v456_v51 = vld [vmem:[%s1533_s4 + $0x28] sm:$0xff]  ;;  %v457_v52 = vld [vmem:[%s1533_s4 + $0x30] sm:$0xff]  ;;  %v458_v53 = vld [vmem:[%s1533_s4 + $0x38] sm:$0xff] }
  0x12   :  { %1037 = vmatmul.mubr.msk.f32.gmra.mrb[4].mxu0 %vm171_vm0, %v36_v19  ;;  %v459_v54 = vld [vmem:[%s1533_s4 + $0x40] sm:$0xff]  ;;  %v460_v55 = vld [vmem:[%s1533_s4 + $0x48] sm:$0xff]  ;;  %v461_v56 = vld [vmem:[%s1533_s4 + $0x50] sm:$0xff] }
  0x13   :  { %1039 = vmatprep.mubr.msk.f32.mxu0 %vm171_vm0, %v37_v20  ;;  %118 = vperm.xlu1 %1179, %v60_v22   ;;  %v462_v57 = vld [vmem:[%s1533_s4 + $0x58] sm:$0xff]  ;;  %v463_v58 = vld [vmem:[%s1533_s4 + $0x60] sm:$0xff]  ;;  %v464_v59 = vld [vmem:[%s1533_s4 + $0x68] sm:$0xff] }
  0x14   :  { %113 = vperm.xlu0 %1178, %v59_v21   ;;  %v465_v60 = vld [vmem:[%s1533_s4 + $0x70] sm:$0xff]  ;;  %v466_v61 = vld [vmem:[%s1533_s4 + $0x78] sm:$0xff]  ;;  %v467_v62 = vld [vmem:[%s1533_s4 + $0x80] sm:$0xff] }
  0x15   :  { %v468_v63 = vld [vmem:[%s1533_s4 + $0x88] sm:$0xff]  ;;  %v469_v0 = vld [vmem:[%s1533_s4 + $0x90] sm:$0xff]  ;;  %v470_v1 = vld [vmem:[%s1533_s4 + $0x98] sm:$0xff] }
  0x16   :  { %1040 = vmatmul.mubr.msk.f32.gmra.mrb[6].mxu0 %vm171_vm0, %v38_v23  ;;  %v828_v2 = vld [vmem:[#allocation2] sm:$0x1] }
  0x17   :  { %1042 = vmatprep.mubr.msk.f32.mxu0 %vm171_vm0, %v39_v24  ;;  %128 = vperm.xlu1 %1179, %v62_v26   ;;  %v431_v3 = vld [vmem:[%s1534_s3] sm:$0xff] }
  0x18   :  { %123 = vperm.xlu0 %1178, %v61_v25   ;;  %1082 = vmatprep.mubr.msk.f32.mxu1 %vm571_vm2, %v431_v3 }
  0x1a   :  { %1043 = vmatmul.mubr.msk.f32.gmra.mrb[8].mxu0 %vm171_vm0, %v40_v27 }
  0x1b   :  { %1045 = vmatprep.mubr.msk.f32.mxu0 %vm171_vm0, %v41_v28  ;;  %138 = vperm.xlu1 %1179, %v64_v30   ;;  %v1181_v28 = vmov 0.0  }
  0x1c   :  { %133 = vperm.xlu0 %1178, %v63_v29  }
  0x1e   :  { %1046 = vmatmul.mubr.msk.f32.gmra.mrb[10].mxu0 %vm171_vm0, %v42_v31 }
  0x1f   :  { %1048 = vmatprep.mubr.msk.f32.mxu0 %vm171_vm0, %v43_v32  ;;  %148 = vperm.xlu1 %1179, %v66_v34  }
  0x20   :  { %143 = vperm.xlu0 %1178, %v65_v33  }
  0x22   :  { %1049 = vmatmul.mubr.msk.f32.gmra.mrb[12].mxu0 %vm171_vm0, %v44_v35 }
  0x23   :  { %1051 = vmatprep.mubr.msk.f32.mxu0 %vm171_vm0, %v45_v36  ;;  %158 = vperm.xlu1 %1179, %v68_v38  }
  0x24   :  { %153 = vperm.xlu0 %1178, %v67_v37  }
  0x26   :  { %1052 = vmatmul.mubr.msk.f32.gmra.mrb[14].mxu0 %vm171_vm0, %v46_v39 }
  0x27   :  { %1054 = vmatprep.mubr.msk.f32.mxu0 %vm171_vm0, %v47_v40  ;;  %168 = vperm.xlu1 %1179, %v70_v42  }
  0x28   :  { %163 = vperm.xlu0 %1178, %v69_v41  }
  0x2a   :  { %1055 = vmatmul.mubr.msk.f32.gmra.mrb[16].mxu0 %vm171_vm0, %v48_v43 }
  0x2b   :  { %1057 = vmatprep.mubr.msk.f32.mxu0 %vm171_vm0, %v49_v44  ;;  %478 = vperm.xlu1 %1179, %v452_v46  }
  0x2c   :  { %473 = vperm.xlu0 %1178, %v451_v45  }
  0x2e   :  { %1058 = vmatmul.mubr.msk.f32.gmra.mrb[18].mxu0 %vm171_vm0, %v50_v47 }
  0x2f   :  { %488 = vperm.xlu1 %1179, %v454_v49   ;;  %1132 = vmatprep.mubr.msk.f32.mxu0 %vm1183_vm3, %v1181_v28 }
  0x30   :  { %483 = vperm.xlu0 %1178, %v453_v48  }
  0x33   :  { %498 = vperm.xlu1 %1179, %v456_v51  }
  0x34   :  { %493 = vperm.xlu0 %1178, %v455_v50  }
  0x37   :  { %508 = vperm.xlu1 %1179, %v458_v53  }
  0x38   :  { %503 = vperm.xlu0 %1178, %v457_v52  }
  0x3b   :  { %518 = vperm.xlu1 %1179, %v460_v55  }
  0x3c   :  { %513 = vperm.xlu0 %1178, %v459_v54  }
  0x3f   :  { %528 = vperm.xlu1 %1179, %v462_v57  }
  0x40   :  { %523 = vperm.xlu0 %1178, %v461_v56  }
  0x43   :  { %538 = vperm.xlu1 %1179, %v464_v59  }
  0x44   :  { %533 = vperm.xlu0 %1178, %v463_v58  }
  0x47   :  { %548 = vperm.xlu1 %1179, %v466_v61  }
  0x48   :  { %543 = vperm.xlu0 %1178, %v465_v60  }
  0x4b   :  { %558 = vperm.xlu1 %1179, %v468_v63  }
  0x4c   :  { %553 = vperm.xlu0 %1178, %v467_v62  }
  0x4f   :  { %568 = vperm.xlu1 %1179, %v470_v1  }
  0x50   :  { %563 = vperm.xlu0 %1178, %v469_v0  }
  0x54   :  { %831 = vperm.xlu0 %1178, %v828_v2  }
  0x82   :  { %v84_v4 = vpop.permute.xlu1 %83 }
  0x83   :  { %v74_v5 = vpop.permute.xlu0 %73 }
  0x86   :  { %v89_v6 = vpop.permute.xlu1 %88 }
  0x87   :  { %v79_v7 = vpop.permute.xlu0 %78 }
  0x8a   :  { %v99_v8 = vpop.permute.xlu1 %98 }
  0x8b   :  { %v94_v9 = vpop.permute.xlu0 %93 }
  0x8e   :  { %v109_v10 = vpop.permute.xlu1 %108 }
  0x8f   :  { %v104_v12 = vpop.permute.xlu0 %103 }
  0x92   :  { %v119_v21 = vpop.permute.xlu1 %118 }
  0x93   :  { %v114_v24 = vpop.permute.xlu0 %113 }
  0x96   :  { %v129_v35 = vpop.permute.xlu1 %128 }
  0x97   :  { %v124_v38 = vpop.permute.xlu0 %123 }
  0x9a   :  { %v139_v49 = vpop.permute.xlu1 %138 }
  0x9b   :  { %v134_v52 = vpop.permute.xlu0 %133 }
  0x9e   :  { %v149_v61 = vpop.permute.xlu1 %148 }
  0x9f   :  { %v144_v1 = vpop.permute.xlu0 %143 }
  0xdd   :  { %v1032_v11 = vpop.f32.mrb[0].mxu0 }
  0xde   :  { %v308_v13 = vadd.f32 %v1032_v11, %v79_v7  ;;  %v302_v14 = vpop.f32.mrb[1].mxu0  ;;  %v159_v11 = vpop.permute.xlu1 %158 }
  0xdf   :  { %v303_v15 = vadd.f32 %v302_v14, %v74_v5  ;;  %v154_v14 = vpop.permute.xlu0 %153 }
  0xe0   :  { %v402_v16 = vmax.f32 %v308_v13, 0.0 }
  0xe1   :  { %v401_v17 = vmax.f32 %v303_v15, 0.0  ;;  %v1035_v18 = vpop.f32.mrb[2].mxu0 }
  0xe2   :  { %v318_v19 = vadd.f32 %v1035_v18, %v89_v6  ;;  %v312_v20 = vpop.f32.mrb[3].mxu0 }
  0xe3   :  { %v421_v22 = vmax.f32 %v401_v17, %v402_v16  ;;  %v313_v23 = vadd.f32 %v312_v20, %v84_v4 }
  0xe4   :  { %v404_v25 = vmax.f32 %v318_v19, 0.0 }
  0xe5   :  { %v403_v26 = vmax.f32 %v313_v23, 0.0  ;;  %v1038_v27 = vpop.f32.mrb[4].mxu0  ;;  %v1139_v29 = vpack.c.bf16 %v421_v22, %v1181_v28 }
  0xe6   :  { %v328_v30 = vadd.f32 %v1038_v27, %v99_v8  ;;  %v322_v31 = vpop.f32.mrb[5].mxu0  ;;  %v164_v27 = vpop.permute.xlu0 %163 }
  0xe7   :  { %v422_v32 = vmax.f32 %v403_v26, %v404_v25  ;;  %v323_v33 = vadd.f32 %v322_v31, %v94_v9  ;;  %1140 = vmatprep.subr.bf16.mxu1 %v1139_v29 }
  0xe8   :  { %v406_v34 = vmax.f32 %v328_v30, 0.0  ;;  %1142 = vmatpush3.bf16.msra.mxu1 %v1139_v29 }
  0xe9   :  { %v405_v36 = vmax.f32 %v323_v33, 0.0  ;;  %v1041_v37 = vpop.f32.mrb[6].mxu0 }
  0xea   :  { %v338_v39 = vadd.f32 %v1041_v37, %v109_v10  ;;  %v332_v40 = vpop.f32.mrb[7].mxu0  ;;  %v432_v37 = vld [vmem:[%s1534_s3 + $0x8] sm:$0xff] }
  0xeb   :  { %v423_v41 = vmax.f32 %v405_v36, %v406_v34  ;;  %v333_v42 = vadd.f32 %v332_v40, %v104_v12  ;;  %v435_v40 = vld [vmem:[%s1534_s3 + $0x20] sm:$0xff] }
  0xec   :  { %v408_v43 = vmax.f32 %v338_v39, 0.0  ;;  %v434_v39 = vld [vmem:[%s1534_s3 + $0x18] sm:$0xff] }
  0xed   :  { %v407_v44 = vmax.f32 %v333_v42, 0.0  ;;  %v1044_v45 = vpop.f32.mrb[8].mxu0  ;;  %v1143_v46 = vpack.c.bf16 %v423_v41, %v422_v32  ;;  %v436_v41 = vld [vmem:[%s1534_s3 + $0x28] sm:$0xff]  ;;  %v437_v42 = vld [vmem:[%s1534_s3 + $0x30] sm:$0xff] }
  0xee   :  { %v348_v47 = vadd.f32 %v1044_v45, %v119_v21  ;;  %v342_v48 = vpop.f32.mrb[9].mxu0  ;;  %v440_v45 = vld [vmem:[%s1534_s3 + $0x48] sm:$0xff] }
  0xef   :  { %v424_v50 = vmax.f32 %v407_v44, %v408_v43  ;;  %v343_v51 = vadd.f32 %v342_v48, %v114_v24  ;;  %1144 = vmatprep.subr.bf16.mxu1 %v1143_v46  ;;  %v169_v24 = vpop.permute.xlu1 %168  ;;  %v438_v43 = vld [vmem:[%s1534_s3 + $0x38] sm:$0xff]  ;;  %v439_v44 = vld [vmem:[%s1534_s3 + $0x40] sm:$0xff] }
  0xf0   :  { %v410_v53 = vmax.f32 %v348_v47, 0.0  ;;  %1146 = vmatpush3.bf16.msra.mxu1 %v1143_v46  ;;  %v441_v46 = vld [vmem:[%s1534_s3 + $0x50] sm:$0xff]  ;;  %v442_v47 = vld [vmem:[%s1534_s3 + $0x58] sm:$0xff]  ;;  %v443_v48 = vld [vmem:[%s1534_s3 + $0x60] sm:$0xff] }
  0xf1   :  { %v409_v54 = vmax.f32 %v343_v51, 0.0  ;;  %v1047_v55 = vpop.f32.mrb[10].mxu0  ;;  %v446_v51 = vld [vmem:[%s1534_s3 + $0x78] sm:$0xff] }
  0xf2   :  { %v358_v56 = vadd.f32 %v1047_v55, %v129_v35  ;;  %v352_v57 = vpop.f32.mrb[11].mxu0  ;;  %v450_v55 = vld [vmem:[%s1534_s3 + $0x98] sm:$0xff] }
  0xf3   :  { %v425_v58 = vmax.f32 %v409_v54, %v410_v53  ;;  %v353_v59 = vadd.f32 %v352_v57, %v124_v38  ;;  %v433_v38 = vld [vmem:[%s1534_s3 + $0x10] sm:$0xff]  ;;  %v448_v53 = vld [vmem:[%s1534_s3 + $0x88] sm:$0xff]  ;;  %v479_v57 = vpop.permute.xlu1 %478 }
  0xf4   :  { %v412_v60 = vmax.f32 %v358_v56, 0.0  ;;  %v449_v54 = vld [vmem:[%s1534_s3 + $0x90] sm:$0xff]  ;;  %v1182_v56 = vmov 0.0|0.0  }
  0xf5   :  { %v411_v62 = vmax.f32 %v353_v59, 0.0  ;;  %v1050_v63 = vpop.f32.mrb[12].mxu0  ;;  %v1147_v0 = vpack.c.bf16 %v425_v58, %v424_v50  ;;  %v445_v50 = vld [vmem:[%s1534_s3 + $0x70] sm:$0xff]  ;;  %1159 = vmatprep.subr.bf16.mxu0 %v1182_v56  ;;  %v474_v58 = vpop.permute.xlu0 %473 }
  0xf6   :  { %v368_v2 = vadd.f32 %v1050_v63, %v139_v49  ;;  %v362_v3 = vpop.f32.mrb[13].mxu0  ;;  %v444_v49 = vld [vmem:[%s1534_s3 + $0x68] sm:$0xff] }
  0xf7   :  { %v426_v4 = vmax.f32 %v411_v62, %v412_v60  ;;  %v363_v5 = vadd.f32 %v362_v3, %v134_v52  ;;  %1148 = vmatprep.subr.bf16.mxu1 %v1147_v0  ;;  %v447_v52 = vld [vmem:[%s1534_s3 + $0x80] sm:$0xff]  ;;  %v489_v59 = vpop.permute.xlu1 %488 }
  0xf8   :  { %v414_v6 = vmax.f32 %v368_v2, 0.0  ;;  %1150 = vmatpush3.bf16.msra.mxu1 %v1147_v0 }
  0xf9   :  { %v413_v7 = vmax.f32 %v363_v5, 0.0  ;;  %v1053_v8 = vpop.f32.mrb[14].mxu0  ;;  %v484_v60 = vpop.permute.xlu0 %483 }
  0xfa   :  { %v378_v9 = vadd.f32 %v1053_v8, %v149_v61  ;;  %v372_v10 = vpop.f32.mrb[15].mxu0 }
  0xfb   :  { %v427_v12 = vmax.f32 %v413_v7, %v414_v6  ;;  %v373_v13 = vadd.f32 %v372_v10, %v144_v1  ;;  %v499_v61 = vpop.permute.xlu1 %498 }
  0xfc   :  { %v416_v15 = vmax.f32 %v378_v9, 0.0 }
  0xfd   :  { %v415_v16 = vmax.f32 %v373_v13, 0.0  ;;  %v1056_v17 = vpop.f32.mrb[16].mxu0  ;;  %v1151_v18 = vpack.c.bf16 %v427_v12, %v426_v4  ;;  %v494_v62 = vpop.permute.xlu0 %493 }
  0xfe   :  { %v388_v19 = vadd.f32 %v1056_v17, %v159_v11  ;;  %v382_v20 = vpop.f32.mrb[17].mxu0 }
  0xff   :  { %v428_v21 = vmax.f32 %v415_v16, %v416_v15  ;;  %v383_v22 = vadd.f32 %v382_v20, %v154_v14  ;;  %1152 = vmatprep.subr.bf16.mxu1 %v1151_v18  ;;  %v509_v63 = vpop.permute.xlu1 %508 }
 0x100   :  { %v418_v23 = vmax.f32 %v388_v19, 0.0  ;;  %1154 = vmatpush3.bf16.msra.mxu1 %v1151_v18 }
 0x101   :  { %v417_v25 = vmax.f32 %v383_v22, 0.0  ;;  %v1059_v26 = vpop.f32.mrb[18].mxu0  ;;  %v504_v1 = vpop.permute.xlu0 %503 }
 0x102   :  { %v398_v29 = vadd.f32 %v1059_v26, %v169_v24  ;;  %v392_v30 = vpop.f32.mrb[19].mxu0 }
 0x103   :  { %v429_v31 = vmax.f32 %v417_v25, %v418_v23  ;;  %v393_v32 = vadd.f32 %v392_v30, %v164_v27  ;;  %v519_v8 = vpop.permute.xlu1 %518 }
 0x104   :  { %v420_v33 = vmax.f32 %v398_v29, 0.0 }
 0x105   :  { %v419_v34 = vmax.f32 %v393_v32, 0.0  ;;  %v1155_v35 = vpack.c.bf16 %v429_v31, %v428_v21  ;;  %v514_v10 = vpop.permute.xlu0 %513 }
 0x107   :  { %v430_v36 = vmax.f32 %v419_v34, %v420_v33  ;;  %1156 = vmatprep.subr.bf16.mxu1 %v1155_v35  ;;  %v529_v19 = vpop.permute.xlu1 %528 }
 0x108   :  { %1158 = vmatpush3.bf16.msra.mxu1 %v1155_v35 }
 0x109   :  { %1080 = vmatprep.subr.mxu1 %v430_v36  ;;  %v524_v23 = vpop.permute.xlu0 %523 }
 0x10b   :  { %v539_v35 = vpop.permute.xlu1 %538 }
 0x10c   :  { %1081 = vmatpush3.msra.mxu1 %v430_v36 }
 0x10d   :  { %1083 = vmatmul.mubr.msk.f32.vlgmr.msra.gmra.mrb[0].mxu1 %vm571_vm2, %v432_v37  ;;  %v534_v37 = vpop.permute.xlu0 %533 }
 0x10e   :  { %1085 = vmatprep.mubr.msk.f32.mxu1 %vm571_vm2, %v433_v38 }
 0x111   :  { %1086 = vmatmul.mubr.msk.f32.gmra.mrb[2].mxu1 %vm571_vm2, %v434_v39 }
 0x112   :  { %1088 = vmatprep.mubr.msk.f32.mxu1 %vm571_vm2, %v435_v40 }
 0x115   :  { %1089 = vmatmul.mubr.msk.f32.gmra.mrb[4].mxu1 %vm571_vm2, %v436_v41 }
 0x116   :  { %1091 = vmatprep.mubr.msk.f32.mxu1 %vm571_vm2, %v437_v42 }
 0x119   :  { %1092 = vmatmul.mubr.msk.f32.gmra.mrb[6].mxu1 %vm571_vm2, %v438_v43 }
 0x11a   :  { %1094 = vmatprep.mubr.msk.f32.mxu1 %vm571_vm2, %v439_v44 }
 0x11d   :  { %1095 = vmatmul.mubr.msk.f32.gmra.mrb[8].mxu1 %vm571_vm2, %v440_v45 }
 0x11e   :  { %1097 = vmatprep.mubr.msk.f32.mxu1 %vm571_vm2, %v441_v46 }
 0x121   :  { %1098 = vmatmul.mubr.msk.f32.gmra.mrb[10].mxu1 %vm571_vm2, %v442_v47  ;;  %v549_v47 = vpop.permute.xlu1 %548 }
 0x122   :  { %1100 = vmatprep.mubr.msk.f32.mxu1 %vm571_vm2, %v443_v48 }
 0x125   :  { %1101 = vmatmul.mubr.msk.f32.gmra.mrb[12].mxu1 %vm571_vm2, %v444_v49 }
 0x126   :  { %1103 = vmatprep.mubr.msk.f32.mxu1 %vm571_vm2, %v445_v50 }
 0x129   :  { %1104 = vmatmul.mubr.msk.f32.gmra.mrb[14].mxu1 %vm571_vm2, %v446_v51  ;;  %v544_v51 = vpop.permute.xlu0 %543 }
 0x12a   :  { %1106 = vmatprep.mubr.msk.f32.mxu1 %vm571_vm2, %v447_v52 }
 0x12d   :  { %1107 = vmatmul.mubr.msk.f32.gmra.mrb[16].mxu1 %vm571_vm2, %v448_v53 }
 0x12e   :  { %1109 = vmatprep.mubr.msk.f32.mxu1 %vm571_vm2, %v449_v54 }
 0x131   :  { %1110 = vmatmul.mubr.msk.f32.gmra.mrb[18].mxu1 %vm571_vm2, %v450_v55 }
 0x1e0   :  { %v1084_v0 = vpop.f32.mrb[0].mxu1 }
 0x1e1   :  { %v698_v2 = vpop.f32.mrb[1].mxu1  ;;  %v704_v3 = vadd.f32 %v1084_v0, %v479_v57  ;;  %v554_v0 = vpop.permute.xlu0 %553 }
 0x1e2   :  { %v699_v4 = vadd.f32 %v698_v2, %v474_v58 }
 0x1e3   :  { %v798_v11 = vmax.f32 %v704_v3, 0.0 }
 0x1e4   :  { %v1087_v5 = vpop.f32.mrb[2].mxu1  ;;  %v797_v12 = vmax.f32 %v699_v4, 0.0 }
 0x1e5   :  { %v714_v6 = vadd.f32 %v1087_v5, %v489_v59  ;;  %v708_v7 = vpop.f32.mrb[3].mxu1 }
 0x1e6   :  { %v709_v9 = vadd.f32 %v708_v7, %v484_v60 }
 0x1e7   :  { %v800_v28 = vmax.f32 %v714_v6, 0.0 }
 0x1e8   :  { %v799_v13 = vmax.f32 %v709_v9, 0.0  ;;  %v1090_v14 = vpop.f32.mrb[4].mxu1 }
 0x1e9   :  { %v818_v15 = vmax.f32 %v798_v11, %v800_v28  ;;  %v718_v16 = vpop.f32.mrb[5].mxu1  ;;  %v724_v18 = vadd.f32 %v1090_v14, %v499_v61 }
 0x1ea   :  { %v817_v17 = vmax.f32 %v797_v12, %v799_v13  ;;  %v719_v21 = vadd.f32 %v718_v16, %v494_v62  ;;  %v559_v62 = vpop.permute.xlu1 %558  ;;  %v564_v13 = vpop.permute.xlu0 %563 }
 0x1eb   :  { %v802_v27 = vmax.f32 %v724_v18, 0.0 }
 0x1ec   :  { %v1160_v20 = vpack.c.bf16 %v818_v15, %v817_v17  ;;  %v1093_v22 = vpop.f32.mrb[6].mxu1  ;;  %v801_v30 = vmax.f32 %v719_v21, 0.0 }
 0x1ed   :  { %v734_v24 = vadd.f32 %v1093_v22, %v509_v63  ;;  %v728_v25 = vpop.f32.mrb[7].mxu1 }
 0x1ee   :  { %v729_v26 = vadd.f32 %v728_v25, %v504_v1  ;;  %1161 = vmatpush3.bf16.msra.mxu0 %v1160_v20  ;;  %v834_v25 = vlaneseq }
 0x1ef   :  { %v804_v29 = vmax.f32 %v734_v24, 0.0  ;;  %1162 = vmatprep.subr.bf16.mxu0 %v1182_v56  ;;  %v827_v24 = vld [vmem:[%s1535_s5] sm:$0x1] }
 0x1f0   :  { %v803_v31 = vmax.f32 %v729_v26, 0.0  ;;  %v1096_v32 = vpop.f32.mrb[8].mxu1  ;;  %v835_v26 = vshrl.u32 %v834_v25, 7 }
 0x1f1   :  { %v820_v33 = vmax.f32 %v802_v27, %v804_v29  ;;  %v738_v34 = vpop.f32.mrb[9].mxu1  ;;  %v744_v38 = vadd.f32 %v1096_v32, %v519_v8  ;;  %v832_v29 = vpop.permute.xlu0 %831 }
 0x1f2   :  { %v819_v36 = vmax.f32 %v801_v30, %v803_v31  ;;  %v739_v40 = vadd.f32 %v738_v34, %v514_v10  ;;  %v569_v10 = vpop.permute.xlu1 %568  ;;  %v836_v27 = vsub.s32 0, %v835_v26 }
 0x1f3   :  { %v806_v45 = vmax.f32 %v744_v38, 0.0 }
 0x1f4   :  { %v1163_v39 = vpack.c.bf16 %v820_v33, %v819_v36  ;;  %v1099_v41 = vpop.f32.mrb[10].mxu1  ;;  %v805_v48 = vmax.f32 %v739_v40, 0.0  ;;  %v837_v30 = vrot.slane %v832_v29, %v836_v27 }
 0x1f5   :  { %v754_v42 = vadd.f32 %v1099_v41, %v529_v19  ;;  %v748_v43 = vpop.f32.mrb[11].mxu1 }
 0x1f6   :  { %v749_v44 = vadd.f32 %v748_v43, %v524_v23  ;;  %1164 = vmatpush3.bf16.msra.mxu0 %v1163_v39 }
 0x1f7   :  { %v808_v46 = vmax.f32 %v754_v42, 0.0  ;;  %1165 = vmatprep.subr.bf16.mxu0 %v1182_v56 }
 0x1f8   :  { %v807_v49 = vmax.f32 %v749_v44, 0.0  ;;  %v1102_v50 = vpop.f32.mrb[12].mxu1 }
 0x1f9   :  { %v822_v52 = vmax.f32 %v806_v45, %v808_v46  ;;  %v758_v53 = vpop.f32.mrb[13].mxu1  ;;  %v764_v55 = vadd.f32 %v1102_v50, %v539_v35 }
 0x1fa   :  { %v821_v54 = vmax.f32 %v805_v48, %v807_v49  ;;  %v759_v58 = vadd.f32 %v758_v53, %v534_v37 }
 0x1fb   :  { %v810_v1 = vmax.f32 %v764_v55, 0.0 }
 0x1fc   :  { %v1166_v57 = vpack.c.bf16 %v822_v52, %v821_v54  ;;  %v1105_v59 = vpop.f32.mrb[14].mxu1  ;;  %v809_v3 = vmax.f32 %v759_v58, 0.0 }
 0x1fd   :  { %v774_v60 = vadd.f32 %v1105_v59, %v549_v47  ;;  %v768_v61 = vpop.f32.mrb[15].mxu1 }
 0x1fe   :  { %v769_v63 = vadd.f32 %v768_v61, %v544_v51  ;;  %1167 = vmatpush3.bf16.msra.mxu0 %v1166_v57 }
 0x1ff   :  { %v812_v2 = vmax.f32 %v774_v60, 0.0  ;;  %1168 = vmatprep.subr.bf16.mxu0 %v1182_v56 }
 0x200   :  { %v811_v4 = vmax.f32 %v769_v63, 0.0  ;;  %v1108_v5 = vpop.f32.mrb[16].mxu1 }
 0x201   :  { %v824_v6 = vmax.f32 %v810_v1, %v812_v2  ;;  %v778_v7 = vpop.f32.mrb[17].mxu1  ;;  %v784_v9 = vadd.f32 %v1108_v5, %v559_v62 }
 0x202   :  { %v823_v8 = vmax.f32 %v809_v3, %v811_v4  ;;  %v779_v28 = vadd.f32 %v778_v7, %v554_v0 }
 0x203   :  { %v814_v17 = vmax.f32 %v784_v9, 0.0 }
 0x204   :  { %v1169_v11 = vpack.c.bf16 %v824_v6, %v823_v8  ;;  %v1111_v12 = vpop.f32.mrb[18].mxu1  ;;  %v813_v19 = vmax.f32 %v779_v28, 0.0 }
 0x205   :  { %v794_v14 = vadd.f32 %v1111_v12, %v569_v10  ;;  %v788_v15 = vpop.f32.mrb[19].mxu1 }
 0x206   :  { %v789_v16 = vadd.f32 %v788_v15, %v564_v13  ;;  %1170 = vmatpush3.bf16.msra.mxu0 %v1169_v11 }
 0x207   :  { %v816_v18 = vmax.f32 %v794_v14, 0.0  ;;  %1171 = vmatprep.subr.bf16.mxu0 %v1182_v56 }
 0x208   :  { %v815_v20 = vmax.f32 %v789_v16, 0.0 }
 0x209   :  { %v826_v21 = vmax.f32 %v814_v17, %v816_v18 }
 0x20a   :  { %v825_v22 = vmax.f32 %v813_v19, %v815_v20 }
 0x20c   :  { %v1172_v23 = vpack.c.bf16 %v826_v21, %v825_v22 }
 0x20e   :  { %1173 = vmatpush3.bf16.msra.mxu0 %v1172_v23 }
 0x211   :  { %1133 = vmatmul.mubr.msk.f32.vlgmr.msra.gmra.mrb[20].mxu0 %vm838_vm4, %v827_v24 }
 0x2e4   :  { %v908_v31 = vpop.f32.mrb[20].mxu0 }
 0x2e5   :  { %v909_v32 = vadd.f32 %v908_v31, %v837_v30  ;;  %v1134_v56 = vpop.f32.mrb[21].mxu0 }
 0x2e7   :  { %912 = vst [vmem:[%s1536_s7] sm:$0x1] %v909_v32 }

</bundles_post_ra>
